<compile_context>
chip_gen: v7x
topology: tpu7x:2x2x1
jax: 0.10.0
libtpu: 0.0.40
codegen_flags: <defaults>
</compile_context>

<pallas_src>
import jax
import jax.numpy as jnp
import numpy as np
from jax.experimental import pallas as pl
from jax.experimental.pallas import tpu as pltpu

_EPS = 1e-8
_LN10 = float(np.log(10.0))


def _round_up(x, m):
    return ((x + m - 1) // m) * m


def _make_sisdr_kernel(scaling: bool, zero_mean: bool, n_time: int):
    inv_n = 1.0 / float(n_time)
    n_f = float(n_time)

    def kernel(est_ref, ref_ref, sdr_ref, scale_ref,
               sr_ref, se_ref, srr_ref, see_ref, sre_ref):
        # est_ref / ref_ref : (BB, S, TT) blocks; time is on the 128-lane axis.
        t = pl.program_id(1)

        @pl.when(t == 0)
        def _init():
            sr_ref[...] = jnp.zeros_like(sr_ref)
            se_ref[...] = jnp.zeros_like(se_ref)
            srr_ref[...] = jnp.zeros_like(srr_ref)
            see_ref[...] = jnp.zeros_like(see_ref)
            sre_ref[...] = jnp.zeros_like(sre_ref)

        r = ref_ref[...].astype(jnp.float32)      # (BB, S, TT)
        e = est_ref[...].astype(jnp.float32)

        # Running sufficient statistics, reduced over the lane (time) axis.
        sr_ref[...] += jnp.sum(r, axis=-1)        # (BB, S)
        se_ref[...] += jnp.sum(e, axis=-1)
        srr_ref[...] += jnp.sum(r * r, axis=-1)
        see_ref[...] += jnp.sum(e * e, axis=-1)
        sre_ref[...] += jnp.sum(e * r, axis=-1)

        @pl.when(t == pl.num_programs(1) - 1)
        def _finalize():
            Sr = sr_ref[...]
            Se = se_ref[...]
            Srr = srr_ref[...]
            See = see_ref[...]
            Sre = sre_ref[...]

            if zero_mean:
                # (x + eps) - mean(x + eps) == x - mean(x): the input eps cancels,
                # so skip the two full-tile adds entirely.
                A = Srr - Sr * Sr * inv_n          # sum(_r ** 2)
                B = Sre - Sr * Se * inv_n          # sum(_e * _r)
                C = See - Se * Se * inv_n          # sum(_e ** 2)
            else:
                # _r = r + eps, _e = e + eps; fold eps algebraically into the
                # reduced sums (exact, matches the torch reference numerics,
                # and avoids two full-(T,S) adds).
                A = Srr + 2.0 * _EPS * Sr + n_f * _EPS * _EPS
                B = Sre + _EPS * Sr + _EPS * Se + n_f * _EPS * _EPS
                C = See + 2.0 * _EPS * Se + n_f * _EPS * _EPS

            proj = A + _EPS
            on_est = B + _EPS

            if scaling:
                scale = on_est / proj
            else:
                scale = jnp.ones_like(on_est)

            # signal = sum((scale*_r)^2), noise = sum((_e - scale*_r)^2)
            signal = scale * scale * A
            noise = C - 2.0 * scale * B + scale * scale * A
            # closed-form noise can round slightly negative; clamp before log
            noise = jnp.maximum(noise, _EPS)

            sdr = -10.0 * (jnp.log(signal / noise + _EPS) / _LN10)

            sdr_ref[...] = sdr[:, None, :]
            scale_ref[...] = scale[:, None, :]

    return kernel


def sisdr_loss(estimates, references, *, scaling=True, return_scaling=False,
               reduction="mean", zero_mean=True, clip_min=None):
    """JAX/Pallas equivalent of SISDRLoss.forward (defaults match the module)."""
    _shape = references.shape
    T, S = int(_shape[-2]), int(_shape[-1])
    references = jnp.reshape(references, (-1, T, S))
    estimates = jnp.reshape(estimates, (-1, T, S))
    B = references.shape[0]

    # (B, T, S) -> (B, S, T): time on the 128-lane axis, sources on sublanes.
    references = jnp.swapaxes(references, -1, -2)
    estimates = jnp.swapaxes(estimates, -1, -2)

    # ---- tiling ------------------------------------------------------------
    t_block = min(2048, _round_up(T, 128))        # multiple of 128 lanes
    T_pad = _round_up(T, t_block)

    itemsize = jnp.dtype(references.dtype).itemsize
    # ~2 MiB of useful input bytes per block; keep >= 2 batch grid steps so
    # the "parallel" batch axis can shard across v7x's 2 TensorCores.
    bb = max(1, (2 * 1024 * 1024) // (S * t_block * itemsize))
    if B >= 2:
        bb = min(bb, max(1, B // 2))
    bb = min(bb, B)
    B_pad = _round_up(B, bb)

    pad_b, pad_t = B_pad - B, T_pad - T
    if pad_b or pad_t:
        # Zero padding is exact: padded samples add 0 to every running sum and
        # the kernel uses the true T for the mean / eps terms.
        references = jnp.pad(references, ((0, pad_b), (0, 0), (0, pad_t)))
        estimates = jnp.pad(estimates, ((0, pad_b), (0, 0), (0, pad_t)))

    grid = (B_pad // bb, T_pad // t_block)
    kernel = _make_sisdr_kernel(scaling, zero_mean, T)

    sdr, scale = pl.pallas_call(
        kernel,
        out_shape=(jax.ShapeDtypeStruct((B_pad, 1, S), jnp.float32),
                   jax.ShapeDtypeStruct((B_pad, 1, S), jnp.float32)),
        grid_spec=pltpu.PrefetchScalarGridSpec(
            num_scalar_prefetch=0,
            grid=grid,
            in_specs=[pl.BlockSpec((bb, S, t_block), lambda b, t: (b, 0, t)),
                      pl.BlockSpec((bb, S, t_block), lambda b, t: (b, 0, t))],
            out_specs=(pl.BlockSpec((bb, 1, S), lambda b, t: (b, 0, 0)),
                       pl.BlockSpec((bb, 1, S), lambda b, t: (b, 0, 0))),
            scratch_shapes=[pltpu.VMEM((bb, S), jnp.float32)] * 5,
        ),
        compiler_params=pltpu.CompilerParams(
            dimension_semantics=("parallel", "arbitrary"),
            vmem_limit_bytes=48 * 1024 * 1024,
        ),
    )(estimates, references)

    if return_scaling:
        return scale[:B]                  # (B, 1, S), same as torch's unsqueeze(1)

    sdr = jnp.reshape(sdr[:B], (B, S))
    if clip_min is not None:
        sdr = jnp.maximum(sdr, clip_min)
    if reduction == "mean":
        sdr = jnp.mean(sdr)
    elif reduction == "sum":
        sdr = jnp.sum(sdr)
    return sdr


def _sisdr_ref(estimates, references, scaling=True, reduction="mean",
               zero_mean=True, clip_min=None):
    """Pure-JAX reference (direct transcription of the PyTorch forward)."""
    eps = 1e-8
    _shape = references.shape
    T, S = _shape[-2], _shape[-1]
    references = jnp.reshape(references, (-1, T, S)) + eps
    estimates = jnp.reshape(estimates, (-1, T, S)) + eps
    if zero_mean:
        mean_reference = references.mean(axis=1, keepdims=True)
        mean_estimate = estimates.mean(axis=1, keepdims=True)
    else:
        mean_reference = 0
        mean_estimate = 0
    _references = references - mean_reference
    _estimates = estimates - mean_estimate
    references_projection = (_references ** 2).sum(axis=-2) + eps
    references_on_estimates = (_estimates * _references).sum(axis=-2) + eps
    scale = (references_on_estimates / references_projection)[:, None, :] if scaling else 1
    e_true = scale * _references
    e_res = _estimates - e_true
    signal = (e_true ** 2).sum(axis=1)
    noise = (e_res ** 2).sum(axis=1)
    sdr = -10 * jnp.log10(signal / noise + eps)
    if clip_min is not None:
        sdr = jnp.maximum(sdr, clip_min)
    if reduction == "mean":
        sdr = sdr.mean()
    elif reduction == "sum":
        sdr = sdr.sum()
    return sdr


if __name__ == "__main__":
    key = jax.random.PRNGKey(0)
    k_ref, k_noise, k_ref2, k_noise2 = jax.random.split(key, 4)

    # case 1: defaults (scaling=True, zero_mean=True, reduction='mean')
    B, T, S = 2, 128, 8
    references = jax.random.normal(k_ref, (B, T, S), dtype=jnp.float32)
    estimates = references + 0.3 * jax.random.normal(k_noise, (B, T, S), dtype=jnp.float32)

    loss = jax.block_until_ready(sisdr_loss(estimates, references))
    expected = jax.block_until_ready(_sisdr_ref(estimates, references))
    assert np.allclose(np.asarray(loss), np.asarray(expected), rtol=1e-4, atol=1e-4), \
        f"case1 mismatch: kernel={loss} ref={expected}"

    # case 2: T not a multiple of 128 (exercises zero-padding), 'sum' reduction
    B2, T2, S2 = 3, 200, 8
    references2 = jax.random.normal(k_ref2, (B2, T2, S2), dtype=jnp.float32)
    estimates2 = references2 + 0.5 * jax.random.normal(k_noise2, (B2, T2, S2), dtype=jnp.float32)

    loss2 = jax.block_until_ready(sisdr_loss(estimates2, references2, reduction="sum"))
    expected2 = jax.block_until_ready(_sisdr_ref(estimates2, references2, reduction="sum"))
    assert np.allclose(np.asarray(loss2), np.asarray(expected2), rtol=1e-4, atol=1e-4), \
        f"case2 mismatch: kernel={loss2} ref={expected2}"

    # case 3: SNR mode (scaling=False, zero_mean=False) — exercises the eps folding
    loss3 = jax.block_until_ready(
        sisdr_loss(estimates, references, scaling=False, zero_mean=False))
    expected3 = jax.block_until_ready(
        _sisdr_ref(estimates, references, scaling=False, zero_mean=False))
    assert np.allclose(np.asarray(loss3), np.asarray(expected3), rtol=1e-4, atol=1e-4), \
        f"case3 mismatch: kernel={loss3} ref={expected3}"

    print("KERNEL_OK")
</pallas_src>

<mosaic_0001>
module attributes {stable_mosaic.version = 11 : i64} {
  func.func @kernel(%arg0: i32, %arg1: i32, %arg2: memref<1x8x128xf32, #tpu.memory_space<vmem>>, %arg3: memref<1x8x128xf32, #tpu.memory_space<vmem>>, %arg4: memref<1x1x8xf32, #tpu.memory_space<vmem>>, %arg5: memref<1x1x8xf32, #tpu.memory_space<vmem>>, %arg6: memref<1x8xf32, #tpu.memory_space<vmem>>, %arg7: memref<1x8xf32, #tpu.memory_space<vmem>>, %arg8: memref<1x8xf32, #tpu.memory_space<vmem>>, %arg9: memref<1x8xf32, #tpu.memory_space<vmem>>, %arg10: memref<1x8xf32, #tpu.memory_space<vmem>>) attributes {dimension_semantics = [#tpu.dimension_semantics<parallel>, #tpu.dimension_semantics<arbitrary>], iteration_bounds = array<i64: 2, 1>, scalar_prefetch = 0 : i64, scratch_operands = 5 : i64, tpu.core_type = #tpu.core_type<tc>, window_params = [{transform_indices = @transform_0, window_bounds = array<i64: 1, 8, 128>}, {transform_indices = @transform_1, window_bounds = array<i64: 1, 8, 128>}, {transform_indices = @transform_2, window_bounds = array<i64: 1, 1, 8>}, {transform_indices = @transform_3, window_bounds = array<i64: 1, 1, 8>}]} {
    %c0_i32 = arith.constant 0 : i32
    %0 = arith.cmpi eq, %arg1, %c0_i32 : i32
    %1 = arith.extui %0 : i1 to i32
    %c0_i32_0 = arith.constant 0 : i32
    %2 = arith.cmpi ne, %1, %c0_i32_0 : i32
    scf.if %2 {
      %cst_32 = arith.constant 0.000000e+00 : f32
      %31 = vector.broadcast %cst_32 : f32 to vector<1x8xf32>
      %c0_33 = arith.constant 0 : index
      %c0_34 = arith.constant 0 : index
      %32 = vector.load %arg6[%c0_33, %c0_34] : memref<1x8xf32, #tpu.memory_space<vmem>>, vector<1x8xf32>
      tpu.vector_store %arg6[%c0_33, %c0_34], %31 {strides = array<i32>} : memref<1x8xf32, #tpu.memory_space<vmem>>, vector<1x8xf32>,
      %cst_35 = arith.constant 0.000000e+00 : f32
      %33 = vector.broadcast %cst_35 : f32 to vector<1x8xf32>
      %c0_36 = arith.constant 0 : index
      %c0_37 = arith.constant 0 : index
      %34 = vector.load %arg7[%c0_36, %c0_37] : memref<1x8xf32, #tpu.memory_space<vmem>>, vector<1x8xf32>
      tpu.vector_store %arg7[%c0_36, %c0_37], %33 {strides = array<i32>} : memref<1x8xf32, #tpu.memory_space<vmem>>, vector<1x8xf32>,
      %cst_38 = arith.constant 0.000000e+00 : f32
      %35 = vector.broadcast %cst_38 : f32 to vector<1x8xf32>
      %c0_39 = arith.constant 0 : index
      %c0_40 = arith.constant 0 : index
      %36 = vector.load %arg8[%c0_39, %c0_40] : memref<1x8xf32, #tpu.memory_space<vmem>>, vector<1x8xf32>
      tpu.vector_store %arg8[%c0_39, %c0_40], %35 {strides = array<i32>} : memref<1x8xf32, #tpu.memory_space<vmem>>, vector<1x8xf32>,
      %cst_41 = arith.constant 0.000000e+00 : f32
      %37 = vector.broadcast %cst_41 : f32 to vector<1x8xf32>
      %c0_42 = arith.constant 0 : index
      %c0_43 = arith.constant 0 : index
      %38 = vector.load %arg9[%c0_42, %c0_43] : memref<1x8xf32, #tpu.memory_space<vmem>>, vector<1x8xf32>
      tpu.vector_store %arg9[%c0_42, %c0_43], %37 {strides = array<i32>} : memref<1x8xf32, #tpu.memory_space<vmem>>, vector<1x8xf32>,
      %cst_44 = arith.constant 0.000000e+00 : f32
      %39 = vector.broadcast %cst_44 : f32 to vector<1x8xf32>
      %c0_45 = arith.constant 0 : index
      %c0_46 = arith.constant 0 : index
      %40 = vector.load %arg10[%c0_45, %c0_46] : memref<1x8xf32, #tpu.memory_space<vmem>>, vector<1x8xf32>
      tpu.vector_store %arg10[%c0_45, %c0_46], %39 {strides = array<i32>} : memref<1x8xf32, #tpu.memory_space<vmem>>, vector<1x8xf32>,
    } else {
    }
    %c0 = arith.constant 0 : index
    %c0_1 = arith.constant 0 : index
    %c0_2 = arith.constant 0 : index
    %3 = vector.load %arg3[%c0, %c0_1, %c0_2] : memref<1x8x128xf32, #tpu.memory_space<vmem>>, vector<1x8x128xf32>
    %c0_3 = arith.constant 0 : index
    %c0_4 = arith.constant 0 : index
    %c0_5 = arith.constant 0 : index
    %4 = vector.load %arg2[%c0_3, %c0_4, %c0_5] : memref<1x8x128xf32, #tpu.memory_space<vmem>>, vector<1x8x128xf32>
    %c0_6 = arith.constant 0 : index
    %c0_7 = arith.constant 0 : index
    %5 = vector.load %arg6[%c0_6, %c0_7] : memref<1x8xf32, #tpu.memory_space<vmem>>, vector<1x8xf32>
    %cst = arith.constant dense<0.000000e+00> : vector<1x8xf32>
    %6 = vector.multi_reduction <add>, %3, %cst [2] : vector<1x8x128xf32> to vector<1x8xf32>
    %7 = arith.addf %5, %6 : vector<1x8xf32>
    %c0_8 = arith.constant 0 : index
    %c0_9 = arith.constant 0 : index
    %8 = vector.load %arg6[%c0_8, %c0_9] : memref<1x8xf32, #tpu.memory_space<vmem>>, vector<1x8xf32>
    tpu.vector_store %arg6[%c0_8, %c0_9], %7 {strides = array<i32>} : memref<1x8xf32, #tpu.memory_space<vmem>>, vector<1x8xf32>,
    %c0_10 = arith.constant 0 : index
    %c0_11 = arith.constant 0 : index
    %9 = vector.load %arg7[%c0_10, %c0_11] : memref<1x8xf32, #tpu.memory_space<vmem>>, vector<1x8xf32>
    %cst_12 = arith.constant dense<0.000000e+00> : vector<1x8xf32>
    %10 = vector.multi_reduction <add>, %4, %cst_12 [2] : vector<1x8x128xf32> to vector<1x8xf32>
    %11 = arith.addf %9, %10 : vector<1x8xf32>
    %c0_13 = arith.constant 0 : index
    %c0_14 = arith.constant 0 : index
    %12 = vector.load %arg7[%c0_13, %c0_14] : memref<1x8xf32, #tpu.memory_space<vmem>>, vector<1x8xf32>
    tpu.vector_store %arg7[%c0_13, %c0_14], %11 {strides = array<i32>} : memref<1x8xf32, #tpu.memory_space<vmem>>, vector<1x8xf32>,
    %c0_15 = arith.constant 0 : index
    %c0_16 = arith.constant 0 : index
    %13 = vector.load %arg8[%c0_15, %c0_16] : memref<1x8xf32, #tpu.memory_space<vmem>>, vector<1x8xf32>
    %14 = arith.mulf %3, %3 : vector<1x8x128xf32>
    %cst_17 = arith.constant dense<0.000000e+00> : vector<1x8xf32>
    %15 = vector.multi_reduction <add>, %14, %cst_17 [2] : vector<1x8x128xf32> to vector<1x8xf32>
    %16 = arith.addf %13, %15 : vector<1x8xf32>
    %c0_18 = arith.constant 0 : index
    %c0_19 = arith.constant 0 : index
    %17 = vector.load %arg8[%c0_18, %c0_19] : memref<1x8xf32, #tpu.memory_space<vmem>>, vector<1x8xf32>
    tpu.vector_store %arg8[%c0_18, %c0_19], %16 {strides = array<i32>} : memref<1x8xf32, #tpu.memory_space<vmem>>, vector<1x8xf32>,
    %c0_20 = arith.constant 0 : index
    %c0_21 = arith.constant 0 : index
    %18 = vector.load %arg9[%c0_20, %c0_21] : memref<1x8xf32, #tpu.memory_space<vmem>>, vector<1x8xf32>
    %19 = arith.mulf %4, %4 : vector<1x8x128xf32>
    %cst_22 = arith.constant dense<0.000000e+00> : vector<1x8xf32>
    %20 = vector.multi_reduction <add>, %19, %cst_22 [2] : vector<1x8x128xf32> to vector<1x8xf32>
    %21 = arith.addf %18, %20 : vector<1x8xf32>
    %c0_23 = arith.constant 0 : index
    %c0_24 = arith.constant 0 : index
    %22 = vector.load %arg9[%c0_23, %c0_24] : memref<1x8xf32, #tpu.memory_space<vmem>>, vector<1x8xf32>
    tpu.vector_store %arg9[%c0_23, %c0_24], %21 {strides = array<i32>} : memref<1x8xf32, #tpu.memory_space<vmem>>, vector<1x8xf32>,
    %c0_25 = arith.constant 0 : index
    %c0_26 = arith.constant 0 : index
    %23 = vector.load %arg10[%c0_25, %c0_26] : memref<1x8xf32, #tpu.memory_space<vmem>>, vector<1x8xf32>
    %24 = arith.mulf %4, %3 : vector<1x8x128xf32>
    %cst_27 = arith.constant dense<0.000000e+00> : vector<1x8xf32>
    %25 = vector.multi_reduction <add>, %24, %cst_27 [2] : vector<1x8x128xf32> to vector<1x8xf32>
    %26 = arith.addf %23, %25 : vector<1x8xf32>
    %c0_28 = arith.constant 0 : index
    %c0_29 = arith.constant 0 : index
    %27 = vector.load %arg10[%c0_28, %c0_29] : memref<1x8xf32, #tpu.memory_space<vmem>>, vector<1x8xf32>
    tpu.vector_store %arg10[%c0_28, %c0_29], %26 {strides = array<i32>} : memref<1x8xf32, #tpu.memory_space<vmem>>, vector<1x8xf32>,
    %c0_i32_30 = arith.constant 0 : i32
    %28 = arith.cmpi eq, %arg1, %c0_i32_30 : i32
    %29 = arith.extui %28 : i1 to i32
    %c0_i32_31 = arith.constant 0 : i32
    %30 = arith.cmpi ne, %29, %c0_i32_31 : i32
    scf.if %30 {
      %c0_32 = arith.constant 0 : index
      %c0_33 = arith.constant 0 : index
      %31 = vector.load %arg6[%c0_32, %c0_33] : memref<1x8xf32, #tpu.memory_space<vmem>>, vector<1x8xf32>
      %c0_34 = arith.constant 0 : index
      %c0_35 = arith.constant 0 : index
      %32 = vector.load %arg7[%c0_34, %c0_35] : memref<1x8xf32, #tpu.memory_space<vmem>>, vector<1x8xf32>
      %c0_36 = arith.constant 0 : index
      %c0_37 = arith.constant 0 : index
      %33 = vector.load %arg8[%c0_36, %c0_37] : memref<1x8xf32, #tpu.memory_space<vmem>>, vector<1x8xf32>
      %c0_38 = arith.constant 0 : index
      %c0_39 = arith.constant 0 : index
      %34 = vector.load %arg9[%c0_38, %c0_39] : memref<1x8xf32, #tpu.memory_space<vmem>>, vector<1x8xf32>
      %c0_40 = arith.constant 0 : index
      %c0_41 = arith.constant 0 : index
      %35 = vector.load %arg10[%c0_40, %c0_41] : memref<1x8xf32, #tpu.memory_space<vmem>>, vector<1x8xf32>
      %36 = arith.mulf %31, %31 : vector<1x8xf32>
      %cst_42 = arith.constant 7.812500e-03 : f32
      %37 = vector.broadcast %cst_42 : f32 to vector<1x8xf32>
      %38 = arith.mulf %36, %37 : vector<1x8xf32>
      %39 = arith.subf %33, %38 : vector<1x8xf32>
      %40 = arith.mulf %31, %32 : vector<1x8xf32>
      %cst_43 = arith.constant 7.812500e-03 : f32
      %41 = vector.broadcast %cst_43 : f32 to vector<1x8xf32>
      %42 = arith.mulf %40, %41 : vector<1x8xf32>
      %43 = arith.subf %35, %42 : vector<1x8xf32>
      %44 = arith.mulf %32, %32 : vector<1x8xf32>
      %cst_44 = arith.constant 7.812500e-03 : f32
      %45 = vector.broadcast %cst_44 : f32 to vector<1x8xf32>
      %46 = arith.mulf %44, %45 : vector<1x8xf32>
      %47 = arith.subf %34, %46 : vector<1x8xf32>
      %cst_45 = arith.constant 9.99999993E-9 : f32
      %48 = vector.broadcast %cst_45 : f32 to vector<1x8xf32>
      %49 = arith.addf %39, %48 : vector<1x8xf32>
      %cst_46 = arith.constant 9.99999993E-9 : f32
      %50 = vector.broadcast %cst_46 : f32 to vector<1x8xf32>
      %51 = arith.addf %43, %50 : vector<1x8xf32>
      %52 = arith.divf %51, %49 : vector<1x8xf32>
      %53 = arith.mulf %52, %52 : vector<1x8xf32>
      %54 = arith.mulf %53, %39 : vector<1x8xf32>
      %cst_47 = arith.constant 2.000000e+00 : f32
      %55 = vector.broadcast %cst_47 : f32 to vector<1x8xf32>
      %56 = arith.mulf %55, %52 : vector<1x8xf32>
      %57 = arith.mulf %56, %43 : vector<1x8xf32>
      %58 = arith.subf %47, %57 : vector<1x8xf32>
      %59 = arith.mulf %52, %52 : vector<1x8xf32>
      %60 = arith.mulf %59, %39 : vector<1x8xf32>
      %61 = arith.addf %58, %60 : vector<1x8xf32>
      %cst_48 = arith.constant 9.99999993E-9 : f32
      %62 = vector.broadcast %cst_48 : f32 to vector<1x8xf32>
      %63 = arith.maximumf %61, %62 : vector<1x8xf32>
      %64 = arith.divf %54, %63 : vector<1x8xf32>
      %cst_49 = arith.constant 9.99999993E-9 : f32
      %65 = vector.broadcast %cst_49 : f32 to vector<1x8xf32>
      %66 = arith.addf %64, %65 : vector<1x8xf32>
      %67 = math.log %66 : vector<1x8xf32>
      %cst_50 = arith.constant 2.30258512 : f32
      %68 = vector.broadcast %cst_50 : f32 to vector<1x8xf32>
      %69 = arith.divf %67, %68 : vector<1x8xf32>
      %cst_51 = arith.constant -1.000000e+01 : f32
      %70 = vector.broadcast %cst_51 : f32 to vector<1x8xf32>
      %71 = arith.mulf %70, %69 : vector<1x8xf32>
      %72 = vector.shape_cast %71 : vector<1x8xf32> to vector<1x1x8xf32>
      %c0_52 = arith.constant 0 : index
      %c0_53 = arith.constant 0 : index
      %c0_54 = arith.constant 0 : index
      %73 = vector.load %arg4[%c0_52, %c0_53, %c0_54] : memref<1x1x8xf32, #tpu.memory_space<vmem>>, vector<1x1x8xf32>
      tpu.vector_store %arg4[%c0_52, %c0_53, %c0_54], %72 {strides = array<i32>} : memref<1x1x8xf32, #tpu.memory_space<vmem>>, vector<1x1x8xf32>,
      %74 = vector.shape_cast %52 : vector<1x8xf32> to vector<1x1x8xf32>
      %c0_55 = arith.constant 0 : index
      %c0_56 = arith.constant 0 : index
      %c0_57 = arith.constant 0 : index
      %75 = vector.load %arg5[%c0_55, %c0_56, %c0_57] : memref<1x1x8xf32, #tpu.memory_space<vmem>>, vector<1x1x8xf32>
      tpu.vector_store %arg5[%c0_55, %c0_56, %c0_57], %74 {strides = array<i32>} : memref<1x1x8xf32, #tpu.memory_space<vmem>>, vector<1x1x8xf32>,
    } else {
    }
    return
  }
  func.func @transform_0(%arg0: i32, %arg1: i32) -> (i32, i32, i32) {
    %c0_i32 = arith.constant 0 : i32
    %c0_i32_0 = arith.constant 0 : i32
    return %arg0, %c0_i32, %arg1 : i32, i32, i32
  }
  func.func @transform_1(%arg0: i32, %arg1: i32) -> (i32, i32, i32) {
    %c0_i32 = arith.constant 0 : i32
    %c0_i32_0 = arith.constant 0 : i32
    return %arg0, %c0_i32, %arg1 : i32, i32, i32
  }
  func.func @transform_2(%arg0: i32, %arg1: i32) -> (i32, i32, i32) {
    %c0_i32 = arith.constant 0 : i32
    %c0_i32_0 = arith.constant 0 : i32
    %c0_i32_1 = arith.constant 0 : i32
    return %arg0, %c0_i32, %c0_i32_0 : i32, i32, i32
  }
  func.func @transform_3(%arg0: i32, %arg1: i32) -> (i32, i32, i32) {
    %c0_i32 = arith.constant 0 : i32
    %c0_i32_0 = arith.constant 0 : i32
    %c0_i32_1 = arith.constant 0 : i32
    return %arg0, %c0_i32, %c0_i32_0 : i32, i32, i32
  }
}

</mosaic_0001>

<bundles_post_ra>
// kernel: tpu_custom_call.1
= control target key start
LH: loop header
LB: loop body
LE: loop exit
PB: predicated region body
PF: predicated region fallthrough
CT: control target
= control target key end

     0   :  { %9 = vsyncpa [#allocation8], 0  ;;  %s1685_s0 = inlined_call_operand.hbm [shape: f32[2,8,128], index: 0, kind: input, shape index: {}]   ;;  %s1686_s1 = inlined_call_operand.hbm [shape: f32[2,8,128], index: 1, kind: input, shape index: {}]   ;;  %s1687_s2 = inlined_call_operand.hbm [shape: f32[2,1,8], index: 2, kind: output, shape index: {0}]   ;;  %s1688_s3 = inlined_call_operand.hbm [shape: f32[2,1,8], index: 3, kind: output, shape index: {1}]  }
   0x1   :  { %11 = vsyncpa [#allocation8 + $0x1], 0 }
   0x2   :  { %12 = vsyncpa [#allocation11], 0 }
   0x3   :  { %14 = vsyncpa [#allocation11 + $0x1], 0 }
   0x4   :  { %15 = vsyncpa [#allocation9], 0 }
   0x5   :  { %17 = vsyncpa [#allocation9 + $0x1], 0 }
   0x6   :  { %18 = vsyncpa [#allocation14], 0 }
   0x7   :  { %20 = vsyncpa [#allocation14 + $0x1], 0  ;;  %s1313_s12 = smov 0   ;;  %s1315_s13 = smov 0  }
   0x8   :  { %s1317_s14 = smov 0   ;;  %s1319_s15 = smov 0  }
   0x9   :  { %s1321_s16 = smov 0   ;;  %s1323_s17 = smov 0  }
   0xa LB: > { %s1008_s18 = sadd.s32 4294967295, %s1284_s17   ;;  %s1009_s19 = sadd.s32 4294967294, %s1284_s17   ;;  %s1284_s17 = sphi %s1323_s17, %s26_s17   ;;  %s1280_s16 = sphi %s1321_s16, %s1708_s16   ;;  %s1276_s15 = sphi %s1319_s15, %s1707_s15   ;;  %s1272_s14 = sphi %s1317_s14, %s1706_s14   ;;  %s1268_s13 = sphi %s1315_s13, %s1705_s13   ;;  %s1264_s12 = sphi %s1313_s12, %s1704_s12  }
   0xb   : > { %s38_s20 = sadd.s32 1, %s1280_s16  ;;  %s47_s21 = sadd.s32 1, %s1272_s14 }
   0xc   : > { %p40_p0 = scmp.ge.s32.totalorder %s38_s20, 2  ;;  %p54_p1 = scmp.ne.s32.totalorder %s1272_s14, %s1268_s13 }
   0xd   : > { %p55_p2 = scmp.eq.s32.totalorder %s1284_s17, 0  ;;  %p60_p3 = scmp.ne.s32.totalorder %s1268_s13, %s1264_s12 }
   0xe   : > { %s1710_s20 = smov (%p40_p0, %s38_s20), 0  ;;  %p61_p5 = scmp.eq.s32.totalorder %s1008_s18, 0 }
   0xf   : > { %p1354_p4 = por %p55_p2, %p54_p1  ;;  %s42_s23 = ssub.s32 %s1280_s16, %s1710_s20 }
  0x10   : > { %p112_p6 = scmp.eq.s32.totalorder %s1008_s18, 1  ;;  %p45_p7 = scmp.eq.s32.totalorder %s42_s23, 0 }
  0x11   : > { %p1360_p8 = por %p61_p5, %p60_p3  ;;  %p118_p10 = scmp.eq.s32.totalorder %s1009_s19, 1 }
  0x12   : > { %p1364_p9 = por %p112_p6, %p54_p1  ;;  %p1045_p13 = scmp.lt.s32.totalorder %s1284_s17, 2 }
  0x13   : > { %s1692_s24 = scalar_select %p1360_p8, 1, 0 }
  0x14   : > { %s1693_s25 = scalar_select %p1364_p9, 1, 0 }
  0x15   : > { %s1369_s26 = scalar_select %p45_p7, %s1272_s14, %s47_s21  }
  0x16   : > { %p1371_p11 = por %p118_p10, %p60_p3  ;;  %s1378_s28 = sand.u32 1, %s1272_s14  }
  0x17   : > { %s1012_s29 = sshll.u32 %s1378_s28, 3  ;;  %s1013_s30 = sshll.u32 %s1280_s16, 7 }
  0x18   : > { %s1694_s27 = scalar_select %p1371_p11, 1, 0 }
  0x19   : > { %s1387_s6 = scalar_lea.hbm %s1685_s0, %s1013_s30  ;;  %s168_s7 = scalar_lea.vmem [#allocation7], %s1012_s29 }
  0x1a   : > { %s176_s8 = sshll.u32 %s168_s7, 4  ;;  %p1395_p0 = pnand %p1045_p13, %p1354_p4  ;;  %s1391_s8 = int_to_ptr.vmem [resolvable:$true] %s176_s8 }
  0x1b   : > { %s165_s10 = scalar_lea.sflag [#allocation8], %s1378_s28  ;;  %s1106_s11 = scalar_lea.hbm %s1387_s6, 128 }
  0x1c   : > { %p1107_p3 = scmp.ne.s32.totalorder %s1387_s6, %s1106_s11  ;;  %p1108_p5 = pneg %p1395_p0 }
  0x1d   : > { %s1111_s21 = scalar_lea.hbm %s1685_s0, 256  ;;  %p1112_p4 = scmp.lt.u32.totalorder %s1387_s6, %s1685_s0 }
  0x1e   : > { %p1109_p6 = pnand %p1108_p5, %p1107_p3  ;;  %p1113_p10 = scmp.lt.u32.totalorder %s1111_s21, %s1106_s11 }
  0x1f   : > { %p1115_p12 = scmp.lt.u32.totalorder %s1106_s11, %s1387_s6 }
  0x20   : > { %p1110_p7 = pneg %p1109_p6  ;;  %p1114_p13 = por %p1113_p10, %p1112_p4 }
  0x22   : > { %p1116_p1 = por %p1115_p12, %p1114_p13 }
  0x24   : > { %p1117_p2 = pnand %p1116_p1, %p1110_p7 }
  0x26   : > { %1120 = shalt.err (!%p1117_p2)
}
  0x27   : > { %s1121_s4 = scalar_lea.vmem %s1391_s8, 128  ;;  %s1286_s5 = smov [#allocation7]  }
  0x28   : > { %p1122_p3 = scmp.ne.s32.totalorder %s1391_s8, %s1121_s4  ;;  %s1126_s7 = sshll.u32 %s1286_s5, 4  ;;  %s1127_s7 = int_to_ptr.vmem [resolvable:$false] %s1126_s7 }
  0x29   : > { %s1128_s18 = scalar_lea.vmem %s1127_s7, 256  ;;  %p1129_p9 = scmp.lt.s32.totalorder %s1391_s8, %s1127_s7 }
  0x2a   : > { %p1124_p6 = pnand %p1122_p3, %p1108_p5  ;;  %p1130_p4 = scmp.lt.s32.totalorder %s1128_s18, %s1121_s4 }
  0x2c   : > { %p1125_p11 = pneg %p1124_p6  ;;  %p1131_p10 = por %p1130_p4, %p1129_p9 }
  0x2e   : > { %p1132_p12 = pnand %p1131_p10, %p1125_p11 }
  0x30   : > { %1135 = shalt.err (!%p1132_p12)
}
  0x31   : > { %1034 = dma.hbm_to_vmem [thread:$0]  (!%p1395_p0), %s1387_s6, 128, %s1391_s8, %s165_s10  }
  0x32   : > { %p1696_p1 = scmp.lt.s32.totalorder %s1284_s17, 3  ;;  %p1697_p2 = scmp.ge.s32.totalorder %s1284_s17, 1 }
  0x33   : > { %s1440_s22 = scalar_lea.hbm %s1686_s1, %s1013_s30  ;;  %s187_s23 = scalar_lea.vmem [#allocation10], %s1012_s29 }
  0x34   : > { %p1431_p7 = pnand %p1697_p2, %p1696_p1  ;;  %s195_s4 = sshll.u32 %s187_s23, 4  ;;  %s196_s4 = int_to_ptr.vmem [resolvable:$true] %s195_s4 }
  0x35   : > { %s184_s6 = scalar_lea.sflag [#allocation11], %s1378_s28  ;;  %s1136_s8 = scalar_lea.hbm %s1440_s22, 128 }
  0x36   : > { %s1698_s11 = scalar_select %p1431_p7, 1, 0 }
  0x37   : > { %p1137_p9 = scmp.ne.s32.totalorder %s1440_s22, %s1136_s8  ;;  %s1141_s30 = scalar_lea.hbm %s1686_s1, 256 }
  0x38   : > { %p1142_p3 = scmp.lt.u32.totalorder %s1440_s22, %s1686_s1  ;;  %p1143_p6 = scmp.lt.u32.totalorder %s1141_s30, %s1136_s8 }
  0x39   : > { %p1139_p11 = pnand %p1137_p9, %p1108_p5  ;;  %p1145_p10 = scmp.lt.u32.totalorder %s1136_s8, %s1440_s22 }
  0x3a   : > { %p1144_p4 = por %p1143_p6, %p1142_p3 }
  0x3b   : > { %p1140_p13 = pneg %p1139_p11 }
  0x3c   : > { %p1146_p12 = por %p1145_p10, %p1144_p4 }
  0x3e   : > { %p1147_p1 = pnand %p1146_p12, %p1140_p13 }
  0x40   : > { %1150 = shalt.err (!%p1147_p1)
}
  0x41   : > { %s1151_s28 = scalar_lea.vmem %s196_s4, 128  ;;  %s1287_s29 = smov [#allocation10]  }
  0x42   : > { %p1152_p2 = scmp.ne.s32.totalorder %s196_s4, %s1151_s28  ;;  %s1156_s19 = sshll.u32 %s1287_s29, 4  ;;  %s1157_s19 = int_to_ptr.vmem [resolvable:$false] %s1156_s19 }
  0x43   : > { %s1158_s21 = scalar_lea.vmem %s1157_s19, 256  ;;  %p1159_p8 = scmp.lt.s32.totalorder %s196_s4, %s1157_s19 }
  0x44   : > { %p1154_p9 = pnand %p1152_p2, %p1108_p5  ;;  %p1160_p7 = scmp.lt.s32.totalorder %s1158_s21, %s1151_s28 }
  0x46   : > { %p1155_p11 = pneg %p1154_p9  ;;  %p1161_p3 = por %p1160_p7, %p1159_p8 }
  0x48   : > { %p1162_p6 = pnand %p1161_p3, %p1155_p11 }
  0x4a   : > { %1165 = shalt.err (!%p1162_p6)
}
  0x4b   : > { %1037 = dma.hbm_to_vmem [thread:$0]  (!%p1395_p0), %s1440_s22, 128, %s196_s4, %s184_s6  }
  0x4c   : > { %p1699_p13 = scmp.ne.s32.totalorder %s1698_s11, 0 }
  0x4d   : > { %s1467_s23 = sand.u32 (!%p1699_p13), 1, %s1268_s13   ;;  %p1700_p5 = scmp.ne.s32.totalorder (!%p1699_p13), %s1692_s24, 0 }
  0x4e   : > { %204 = sbr.rel (%p1699_p13) target bundleno = 482 (0x1e2), region = 28  ;;  %s1017_s8 = sshll.u32 (!%p1699_p13), %s1467_s23, 3 }
  0x4f   : > { %s207_s10 = scalar_lea.sflag (!%p1699_p13), [#allocation8], %s1467_s23  ;;  %s210_s5 = scalar_lea.vmem (!%p1699_p13), [#allocation7], %s1017_s8 }
  0x55   : > { %1247 = dma.done.wait (%p1700_p5), %s207_s10, 128  }
  0x56   : > { %1249 = vsyncadd (%p1700_p5), %s207_s10, 4294967168  ;;  %s216_s9 = scalar_lea.sflag [#allocation11], %s1467_s23  ;;  %s219_s22 = scalar_lea.vmem [#allocation10], %s1017_s8 }
  0x57   : > { %1251 = dma.done.wait (%p1700_p5), %s216_s9, 128  }
  0x58   : > { %1253 = vsyncadd (%p1700_p5), %s216_s9, 4294967168  ;;  %v261_v0 = vld [vmem:[%s210_s5] sm:$0xff]  ;;  %v260_v1 = vld [vmem:[%s219_s22] sm:$0xff]  ;;  %v1288_v5 = vmov 0   ;;  %v266_v6 = vlaneseq  ;;  %vm254_vm0 = vcmask 57344   ;;  %v1289_v9 = vmov 0.0  }
  0x59   : > { %375 = vadd.xlane.f32.xlu1 %v261_v0  ;;  %263 = vadd.xlane.f32.xlu0 %v260_v1  ;;  %v484_v2 = vmul.f32 %v260_v1, %v260_v1  ;;  %v704_v3 = vmul.f32 %v261_v0, %v260_v1  ;;  %v594_v4 = vmul.f32 %v261_v0, %v261_v0  ;;  %v1290_v11 = vmov 1966171168   ;;  %s1019_s24 = sshll.u32 %s1276_s15, 4  ;;  %s249_s11 = scalar_lea.vmem [#allocation13], %s1467_s23 }
  0x5a   : > { %1099 = vset.pattern.permute.xlu0 %v1288_v5  ;;  %1098 = vset.pattern.permute.xlu1 %v1288_v5  ;;  %v267_v7 = vshrl.u32 %v266_v6, 7  ;;  %v351_v8 = vand.u32 127, %v266_v6  ;;  %255 = vst.msk [vmem:[#allocation2] sm:$0x1] %vm254_vm0, %v1289_v9  ;;  %256 = vst.msk [vmem:[#allocation3] sm:$0x1] %vm254_vm0, %v1289_v9  ;;  %v303_v12 = vunpack.c.l.s4 %v1290_v11  ;;  %s1602_s7 = scalar_lea.hbm %s1688_s3, %s1019_s24 }
  0x5b   : > { %257 = vst.msk [vmem:[#allocation4] sm:$0x1] %vm254_vm0, %v1289_v9  ;;  %258 = vst.msk [vmem:[#allocation5] sm:$0x1] %vm254_vm0, %v1289_v9  ;;  %s881_s4 = sshll.u32 %s249_s11, 4  ;;  %s856_s18 = scalar_lea.sflag [#allocation14], %s1467_s23  ;;  %s1604_s4 = int_to_ptr.vmem [resolvable:$true] %s881_s4 }
  0x5c   : > { %259 = vst.msk [vmem:[#allocation6] sm:$0x1] %vm254_vm0, %v1289_v9  ;;  %v1485_v10 = vsub.s32 %v351_v8, %v267_v7  ;;  %v304_v13 = vunpack.c.0.s8 %v303_v12  ;;  %v1487_v14 = vsub.s32 0, %v267_v7  ;;  %v1489_v15 = vsub.s32 1, %v267_v7  ;;  %s1166_s28 = scalar_lea.vmem %s1604_s4, 16  ;;  %p1701_p0 = scmp.ne.s32.totalorder %s1693_s25, 0 }
  0x5d   : > { %485 = vadd.xlane.f32.xlu0 %v484_v2  ;;  %705 = vadd.xlane.f32.xlu1 %v704_v3  ;;  %v1491_v16 = vsub.s32 2, %v267_v7  ;;  %v1493_v17 = vsub.s32 3, %v267_v7  ;;  %v1495_v18 = vsub.s32 4, %v267_v7  ;;  %v1497_v19 = vsub.s32 5, %v267_v7  ;;  %p1167_p8 = scmp.ne.s32.totalorder %s1604_s4, %s1166_s28  ;;  %s1291_s29 = smov [#allocation13]  }
  0x5e   : > { %v1499_v20 = vsub.s32 6, %v267_v7  ;;  %v1501_v21 = vsub.s32 7, %v267_v7  ;;  %v1503_v24 = vsub.s32 %v304_v13, %v267_v7  ;;  %s1170_s19 = sshll.u32 %s1291_s29, 4  ;;  %s1171_s19 = int_to_ptr.vmem [resolvable:$false] %s1170_s19 }
  0x5f   : > { %p1168_p7 = pnand %p1167_p8, %p1701_p0  ;;  %s1172_s21 = scalar_lea.vmem %s1171_s19, 32 }
  0x60   : > { %p1173_p10 = scmp.lt.s32.totalorder %s1604_s4, %s1171_s19  ;;  %p1174_p12 = scmp.lt.s32.totalorder %s1172_s21, %s1166_s28 }
  0x61   : > { %595 = vadd.xlane.f32.xlu0 %v594_v4  ;;  %p1169_p4 = pneg %p1168_p7 }
  0x62   : > { %p1175_p1 = por %p1174_p12, %p1173_p10 }
  0x64   : > { %p1176_p2 = pnand %p1175_p1, %p1169_p4 }
  0xe6   : > { %v376_v22 = vpop.xlane.xlu1 %375  ;;  %v264_v23 = vpop.xlane.xlu0 %263 }
  0xe7   : > { %v269_v25 = vrot.slane %v264_v23, %v1487_v14  ;;  %v273_v26 = vrot.slane %v264_v23, %v1489_v15  ;;  %v277_v27 = vrot.slane %v264_v23, %v1491_v16  ;;  %v281_v28 = vrot.slane %v264_v23, %v1493_v17 }
  0xe8   : > { %v285_v29 = vrot.slane %v264_v23, %v1495_v18  ;;  %v289_v30 = vrot.slane %v264_v23, %v1497_v19  ;;  %v293_v31 = vrot.slane %v264_v23, %v1499_v20  ;;  %v297_v32 = vrot.slane %v264_v23, %v1501_v21 }
  0xe9   : > { %v298_v33 = vcombine.low %v269_v25, %v273_v26  ;;  %v299_v34 = vcombine.low %v277_v27, %v281_v28  ;;  %v381_v35 = vrot.slane %v376_v22, %v1487_v14  ;;  %v385_v36 = vrot.slane %v376_v22, %v1489_v15 }
  0xea   : > { %v486_v37 = vpop.xlane.xlu0 %485  ;;  %v300_v38 = vcombine.low %v285_v29, %v289_v30  ;;  %v301_v39 = vcombine.low %v293_v31, %v297_v32  ;;  %v389_v40 = vrot.slane %v376_v22, %v1491_v16  ;;  %v393_v41 = vrot.slane %v376_v22, %v1493_v17  ;;  %v706_v29 = vpop.xlane.xlu1 %705 }
  0xeb   : > { %v308_v42 = vrot.slane %v298_v33, %v1503_v24  ;;  %v315_v43 = vrot.slane %v299_v34, %v1503_v24  ;;  %v397_v44 = vrot.slane %v376_v22, %v1495_v18  ;;  %v401_v45 = vrot.slane %v376_v22, %v1497_v19 }
  0xec   : > { %v322_v46 = vrot.slane %v300_v38, %v1503_v24  ;;  %v329_v47 = vrot.slane %v301_v39, %v1503_v24  ;;  %v405_v48 = vrot.slane %v376_v22, %v1499_v20  ;;  %v409_v49 = vrot.slane %v376_v22, %v1501_v21 }
  0xed   : > { %v330_v50 = vcombine.low %v308_v42, %v315_v43  ;;  %v410_v51 = vcombine.low %v381_v35, %v385_v36  ;;  %v411_v52 = vcombine.low %v389_v40, %v393_v41  ;;  %v412_v53 = vcombine.low %v397_v44, %v401_v45 }
  0xee   : > { %v331_v54 = vcombine.low %v322_v46, %v329_v47  ;;  %v413_v55 = vcombine.low %v405_v48, %v409_v49  ;;  %v491_v56 = vrot.slane %v486_v37, %v1487_v14  ;;  %v495_v57 = vrot.slane %v486_v37, %v1489_v15  ;;  %v596_v62 = vpop.xlane.xlu0 %595 }
  0xef   : > { %v338_v58 = vrot.slane %v330_v50, %v1503_v24  ;;  %v420_v59 = vrot.slane %v410_v51, %v1503_v24  ;;  %v427_v60 = vrot.slane %v411_v52, %v1503_v24  ;;  %v434_v61 = vrot.slane %v412_v53, %v1503_v24 }
  0xf0   : > { %v345_v63 = vrot.slane %v331_v54, %v1503_v24  ;;  %v441_v0 = vrot.slane %v413_v55, %v1503_v24  ;;  %v499_v1 = vrot.slane %v486_v37, %v1491_v16  ;;  %v503_v2 = vrot.slane %v486_v37, %v1493_v17 }
  0xf1   : > { %v442_v3 = vcombine.low %v420_v59, %v427_v60  ;;  %v507_v4 = vrot.slane %v486_v37, %v1495_v18  ;;  %v511_v5 = vrot.slane %v486_v37, %v1497_v19  ;;  %v515_v6 = vrot.slane %v486_v37, %v1499_v20 }
  0xf2   : > { %v346_v7 = vcombine.low %v338_v58, %v345_v63  ;;  %v443_v8 = vcombine.low %v434_v61, %v441_v0  ;;  %v519_v9 = vrot.slane %v486_v37, %v1501_v21  ;;  %v520_v11 = vcombine.low %v491_v56, %v495_v57 }
  0xf3   : > { %v450_v12 = vrot.slane %v442_v3, %v1503_v24  ;;  %v521_v13 = vcombine.low %v499_v1, %v503_v2  ;;  %v522_v22 = vcombine.low %v507_v4, %v511_v5  ;;  %v601_v23 = vrot.slane %v596_v62, %v1487_v14 }
  0xf4   : > { %348 = vperm.xlu1 %1098, %v346_v7   ;;  %v457_v25 = vrot.slane %v443_v8, %v1503_v24  ;;  %v523_v26 = vcombine.low %v515_v6, %v519_v9  ;;  %v530_v27 = vrot.slane %v520_v11, %v1503_v24  ;;  %v605_v28 = vrot.slane %v596_v62, %v1489_v15  ;;  %v262_v11 = vld [vmem:[#allocation2] sm:$0x1] }
  0xf5   : > { %v537_v30 = vrot.slane %v521_v13, %v1503_v24  ;;  %v544_v31 = vrot.slane %v522_v22, %v1503_v24  ;;  %v609_v32 = vrot.slane %v596_v62, %v1491_v16  ;;  %v613_v33 = vrot.slane %v596_v62, %v1493_v17 }
  0xf6   : > { %v458_v34 = vcombine.low %v450_v12, %v457_v25  ;;  %v551_v35 = vrot.slane %v523_v26, %v1503_v24  ;;  %v617_v36 = vrot.slane %v596_v62, %v1495_v18  ;;  %v621_v37 = vrot.slane %v596_v62, %v1497_v19  ;;  %v374_v26 = vld [vmem:[#allocation3] sm:$0x1] }
  0xf7   : > { %v552_v38 = vcombine.low %v530_v27, %v537_v30  ;;  %v625_v39 = vrot.slane %v596_v62, %v1499_v20  ;;  %v629_v40 = vrot.slane %v596_v62, %v1501_v21  ;;  %v630_v41 = vcombine.low %v601_v23, %v605_v28 }
  0xf8   : > { %460 = vperm.xlu0 %1099, %v458_v34   ;;  %v553_v42 = vcombine.low %v544_v31, %v551_v35  ;;  %v631_v43 = vcombine.low %v609_v32, %v613_v33  ;;  %v632_v44 = vcombine.low %v617_v36, %v621_v37  ;;  %v711_v45 = vrot.slane %v706_v29, %v1487_v14  ;;  %v483_v32 = vld [vmem:[#allocation4] sm:$0x1] }
  0xf9   : > { %v560_v46 = vrot.slane %v552_v38, %v1503_v24  ;;  %v633_v47 = vcombine.low %v625_v39, %v629_v40  ;;  %v640_v48 = vrot.slane %v630_v41, %v1503_v24  ;;  %v715_v49 = vrot.slane %v706_v29, %v1489_v15  ;;  %v593_v39 = vld [vmem:[#allocation5] sm:$0x1] }
  0xfa   : > { %v567_v50 = vrot.slane %v553_v42, %v1503_v24  ;;  %v647_v51 = vrot.slane %v631_v43, %v1503_v24  ;;  %v654_v52 = vrot.slane %v632_v44, %v1503_v24  ;;  %v719_v53 = vrot.slane %v706_v29, %v1491_v16 }
  0xfb   : > { %v661_v54 = vrot.slane %v633_v47, %v1503_v24  ;;  %v723_v55 = vrot.slane %v706_v29, %v1493_v17  ;;  %v727_v14 = vrot.slane %v706_v29, %v1495_v18  ;;  %v731_v56 = vrot.slane %v706_v29, %v1497_v19  ;;  %v703_v47 = vld [vmem:[#allocation6] sm:$0x1] }
  0xfc   : > { %v568_v57 = vcombine.low %v560_v46, %v567_v50  ;;  %v662_v58 = vcombine.low %v640_v48, %v647_v51  ;;  %v735_v15 = vrot.slane %v706_v29, %v1499_v20  ;;  %v739_v59 = vrot.slane %v706_v29, %v1501_v21 }
  0xfd   : > { %v663_v60 = vcombine.low %v654_v52, %v661_v54  ;;  %v740_v61 = vcombine.low %v711_v45, %v715_v49  ;;  %v741_v62 = vcombine.low %v719_v53, %v723_v55  ;;  %v742_v63 = vcombine.low %v727_v14, %v731_v56 }
  0xfe   : > { %570 = vperm.xlu1 %1098, %v568_v57   ;;  %v670_v16 = vrot.slane %v662_v58, %v1503_v24  ;;  %v743_v0 = vcombine.low %v735_v15, %v739_v59 }
  0xff   : > { %v677_v17 = vrot.slane %v663_v60, %v1503_v24  ;;  %v750_v18 = vrot.slane %v740_v61, %v1503_v24  ;;  %v757_v19 = vrot.slane %v741_v62, %v1503_v24  ;;  %v764_v1 = vrot.slane %v742_v63, %v1503_v24 }
 0x100   : > { %v771_v20 = vrot.slane %v743_v0, %v1503_v24 }
 0x101   : > { %v678_v2 = vcombine.low %v670_v16, %v677_v17  ;;  %v772_v21 = vcombine.low %v750_v18, %v757_v19 }
 0x102   : > { %v773_v3 = vcombine.low %v764_v1, %v771_v20 }
 0x103   : > { %680 = vperm.xlu1 %1098, %v678_v2   ;;  %v780_v4 = vrot.slane %v772_v21, %v1503_v24 }
 0x104   : > { %v787_v5 = vrot.slane %v773_v3, %v1503_v24 }
 0x106   : > { %v788_v6 = vcombine.low %v780_v4, %v787_v5 }
 0x108   : > { %790 = vperm.xlu1 %1098, %v788_v6  }
 0x173   : > { %v349_v7 = vpop.permute.xlu1 %348 }
 0x174   : > { %v355_v8 = vrot.slane %v349_v7, %v1485_v10 }
 0x176   : > { %v362_v9 = vrot.slane %v355_v8, %v1503_v24 }
 0x177   : > { %v461_v12 = vpop.permute.xlu0 %460 }
 0x178   : > { %v369_v13 = vrot.slane %v362_v9, %v1503_v24  ;;  %v465_v22 = vrot.slane %v461_v12, %v1485_v10 }
 0x17a   : > { %v371_v23 = vadd.f32 %v369_v13, %v262_v11  ;;  %v472_v25 = vrot.slane %v465_v22, %v1503_v24 }
 0x17c   : > { %373 = vst.msk [vmem:[#allocation2] sm:$0x1] %vm254_vm0, %v371_v23  ;;  %v479_v27 = vrot.slane %v472_v25, %v1503_v24 }
 0x17d   : > { %v571_v28 = vpop.permute.xlu1 %570 }
 0x17e   : > { %v481_v29 = vadd.f32 %v479_v27, %v374_v26  ;;  %v575_v30 = vrot.slane %v571_v28, %v1485_v10 }
 0x180   : > { %482 = vst.msk [vmem:[#allocation3] sm:$0x1] %vm254_vm0, %v481_v29  ;;  %v582_v31 = vrot.slane %v575_v30, %v1503_v24 }
 0x182   : > { %v589_v33 = vrot.slane %v582_v31, %v1503_v24  ;;  %v681_v34 = vpop.permute.xlu1 %680 }
 0x183   : > { %v685_v35 = vrot.slane %v681_v34, %v1485_v10  ;;  %v816_v36 = vld [vmem:[#allocation2] sm:$0x1] }
 0x184   : > { %v591_v37 = vadd.f32 %v589_v33, %v483_v32  ;;  %v821_v40 = vmul.f32 %v816_v36, %v816_v36 }
 0x185   : > { %v692_v38 = vrot.slane %v685_v35, %v1503_v24 }
 0x186   : > { %592 = vst.msk [vmem:[#allocation4] sm:$0x1] %vm254_vm0, %v591_v37  ;;  %v822_v46 = vmul.f32 0.0078125, %v821_v40 }
 0x187   : > { %v699_v41 = vrot.slane %v692_v38, %v1503_v24  ;;  %v791_v42 = vpop.permute.xlu1 %790  ;;  %v817_v52 = vld [vmem:[#allocation3] sm:$0x1] }
 0x188   : > { %v795_v43 = vrot.slane %v791_v42, %v1485_v10  ;;  %v824_v10 = vmul.f32 %v817_v52, %v816_v36  ;;  %v827_v56 = vmul.f32 %v817_v52, %v817_v52 }
 0x189   : > { %v701_v44 = vadd.f32 %v699_v41, %v593_v39 }
 0x18a   : > { %v802_v45 = vrot.slane %v795_v43, %v1503_v24  ;;  %v825_v54 = vmul.f32 0.0078125, %v824_v10  ;;  %v828_v58 = vmul.f32 0.0078125, %v827_v56 }
 0x18b   : > { %702 = vst.msk [vmem:[#allocation5] sm:$0x1] %vm254_vm0, %v701_v44 }
 0x18c   : > { %v809_v48 = vrot.slane %v802_v45, %v1503_v24 }
 0x18d   : > { %v818_v49 = vld [vmem:[#allocation4] sm:$0x1] }
 0x18e   : > { %v811_v50 = vadd.f32 %v809_v48, %v703_v47  ;;  %v823_v51 = vsub.f32 %v818_v49, %v822_v46 }
 0x190   : > { %812 = vst.msk [vmem:[#allocation6] sm:$0x1] %vm254_vm0, %v811_v50  ;;  %v830_v53 = vadd.f32 1e-08, %v823_v51 }
 0x192   : > { %1100 = vrcp.f32 %v830_v53  ;;  %v819_v59 = vld [vmem:[#allocation5] sm:$0x1] }
 0x197   : > { %v820_v55 = vld [vmem:[#allocation6] sm:$0x1] }
 0x198   : > { %v826_v14 = vsub.f32 %v820_v55, %v825_v54 }
 0x19a   : > { %v831_v24 = vadd.f32 1e-08, %v826_v14 }
 0x19c   : > { %v1101_v57 = vpop.eup %1100 }
 0x19d   : > { %v833_v15 = vmul.f32 %v1101_v57, %v831_v24 }
 0x19f   : > { %v834_v60 = vmul.f32 %v833_v15, %v833_v15  ;;  %v836_v61 = vmul.f32 2.0, %v833_v15  ;;  %850 = vst.msk [vmem:[%s249_s11] sm:$0x1] %vm254_vm0, %v833_v15 }
 0x1a0   : > { %1179 = shalt.err (!%p1176_p2)
}
 0x1a1   : > { %s1180_s8 = scalar_lea.hbm %s1602_s7, 16  ;;  %s1184_s9 = scalar_lea.hbm %s1688_s3, 32 }
 0x1a2   : > { %p1181_p9 = scmp.ne.s32.totalorder %s1602_s7, %s1180_s8  ;;  %p1185_p6 = scmp.lt.u32.totalorder %s1602_s7, %s1688_s3 }
 0x1a3   : > { %p1186_p13 = scmp.lt.u32.totalorder %s1184_s9, %s1180_s8  ;;  %p1188_p8 = scmp.lt.u32.totalorder %s1180_s8, %s1602_s7 }
 0x1a4   : > { %p1182_p11 = pnand %p1181_p9, %p1701_p0 }
 0x1a5   : > { %p1187_p5 = por %p1186_p13, %p1185_p6 }
 0x1a6   : > { %p1183_p3 = pneg %p1182_p11 }
 0x1a7   : > { %p1189_p7 = por %p1188_p8, %p1187_p5 }
 0x1a9   : > { %p1190_p4 = pnand %p1189_p7, %p1183_p3 }
 0x1ab   : > { %1193 = shalt.err (!%p1190_p4)
}
 0x1ac   : > { %1028 = dma.vmem_to_hbm [thread:$0]  (%p1701_p0), %s1604_s4, 16, %s1602_s7, %s856_s18   ;;  %v829_v62 = vsub.f32 %v819_v59, %v828_v58  ;;  %v837_v63 = vmul.f32 %v836_v61, %v826_v14  ;;  %v835_v16 = vmul.f32 %v834_v60, %v823_v51 }
 0x1ad   : > { %s243_s6 = scalar_lea.vmem [#allocation12], %s1467_s23  ;;  %s1635_s18 = scalar_lea.hbm %s1687_s2, %s1019_s24 }
 0x1ae   : > { %v838_v0 = vsub.f32 %v829_v62, %v837_v63  ;;  %s868_s30 = sshll.u32 %s243_s6, 4  ;;  %s852_s28 = scalar_lea.sflag [#allocation9], %s1467_s23  ;;  %s1637_s30 = int_to_ptr.vmem [resolvable:$true] %s868_s30 }
 0x1af   : > { %s1194_s29 = scalar_lea.vmem %s1637_s30, 16  ;;  %s1292_s19 = smov [#allocation12]  }
 0x1b0   : > { %v839_v17 = vadd.f32 %v838_v0, %v835_v16  ;;  %p1195_p10 = scmp.ne.s32.totalorder %s1637_s30, %s1194_s29  ;;  %s1198_s15 = sshll.u32 %s1292_s19, 4  ;;  %s1199_s15 = int_to_ptr.vmem [resolvable:$false] %s1198_s15 }
 0x1b1   : > { %s1200_s21 = scalar_lea.vmem %s1199_s15, 32  ;;  %p1201_p2 = scmp.lt.s32.totalorder %s1637_s30, %s1199_s15 }
 0x1b2   : > { %v840_v18 = vmax.f32 %v839_v17, 1e-08  ;;  %p1196_p12 = pnand %p1195_p10, %p1701_p0  ;;  %p1202_p9 = scmp.lt.s32.totalorder %s1200_s21, %s1194_s29 }
 0x1b4   : > { %1102 = vrcp.f32 %v840_v18  ;;  %p1197_p1 = pneg %p1196_p12  ;;  %p1203_p11 = por %p1202_p9, %p1201_p2 }
 0x1b6   : > { %p1204_p3 = pnand %p1203_p11, %p1197_p1 }
 0x1be   : > { %v1103_v19 = vpop.eup %1102 }
 0x1bf   : > { %v842_v1 = vmul.f32 %v1103_v19, %v835_v16 }
 0x1c1   : > { %v843_v20 = vadd.f32 1e-08, %v842_v1 }
 0x1c3   : > { %1104 = vlog2.f32 %v843_v20 }
 0x1cd   : > { %v1105_v2 = vpop.eup %1104 }
 0x1ce   : > { %v845_v21 = vmul.f32 0.6931472, %v1105_v2 }
 0x1d0   : > { %v847_v3 = vmul.f32 0.43429446, %v845_v21 }
 0x1d2   : > { %v848_v4 = vmul.f32 -10.0, %v847_v3 }
 0x1d4   : > { %849 = vst.msk [vmem:[%s243_s6] sm:$0x1] %vm254_vm0, %v848_v4 }
 0x1d5   : > { %1207 = shalt.err (!%p1204_p3)
}
 0x1d6   : > { %s1208_s23 = scalar_lea.hbm %s1635_s18, 16  ;;  %s1212_s10 = scalar_lea.hbm %s1687_s2, 32 }
 0x1d7   : > { %p1209_p6 = scmp.ne.s32.totalorder %s1635_s18, %s1208_s23  ;;  %p1213_p8 = scmp.lt.u32.totalorder %s1635_s18, %s1687_s2 }
 0x1d8   : > { %p1214_p7 = scmp.lt.u32.totalorder %s1212_s10, %s1208_s23  ;;  %p1216_p10 = scmp.lt.u32.totalorder %s1208_s23, %s1635_s18 }
 0x1d9   : > { %p1210_p13 = pnand %p1209_p6, %p1701_p0 }
 0x1da   : > { %p1215_p4 = por %p1214_p7, %p1213_p8 }
 0x1db   : > { %p1211_p5 = pneg %p1210_p13 }
 0x1dc   : > { %p1217_p12 = por %p1216_p10, %p1215_p4 }
 0x1de   : > { %p1218_p1 = pnand %p1217_p12, %p1211_p5 }
 0x1e0   : > { %1221 = shalt.err (!%p1218_p1)
}
 0x1e1   : > { %1027 = dma.vmem_to_hbm [thread:$0]  (%p1701_p0), %s1637_s30, 16, %s1635_s18, %s852_s28  }
 0x1e2 PF: > { %s893_s22 = sand.u32 1, %s1264_s12   ;;  %p1702_p2 = scmp.ne.s32.totalorder %s1694_s27, 0 }
 0x1e3   : > { %p1703_p9 = scmp.ge.s32.totalorder %s1284_s17, 2  ;;  %s894_s11 = scalar_lea.sflag [#allocation9], %s893_s22 }
 0x1e5   : > { %p1039_p11 = pnand %p1703_p9, %p1702_p2 }
 0x1e7   : > { %1255 = dma.done.wait (!%p1039_p11), %s894_s11, 16  }
 0x1e8   : > { %1257 = vsyncadd (!%p1039_p11), %s894_s11, 4294967280  ;;  %s902_s6 = scalar_lea.sflag [#allocation14], %s893_s22 }
 0x1e9   : > { %1259 = dma.done.wait (!%p1039_p11), %s902_s6, 16  }
 0x1ea   : > { %1261 = vsyncadd (!%p1039_p11), %s902_s6, 4294967280  ;;  %s26_s17 = sadd.s32 1, %s1284_s17   ;;  %s1704_s12 = smov %s1268_s13 }
 0x1eb   : > { %p23_p3 = scmp.ge.s32.totalorder %s26_s17, 4   ;;  %s1705_s13 = smov %s1272_s14 }
 0x1ec   : > { %s1706_s14 = smov %s1369_s26  ;;  %s1707_s15 = smov %s1280_s16 }
 0x1ed   : > { %s1708_s16 = smov %s1710_s20  ;;  %25 = sbr.rel (!%p23_p3) target bundleno = 10 (0xa), region = 111 }
 0x1f4   :  { %906 = vsyncpa [#allocation8], 1 }
 0x1f5   :  { %908 = vsyncpa [#allocation8 + $0x1], 1 }
 0x1f6   :  { %909 = vsyncpa [#allocation11], 1 }
 0x1f7   :  { %911 = vsyncpa [#allocation11 + $0x1], 1 }
 0x1f8   :  { %912 = vsyncpa [#allocation9], 1 }
 0x1f9   :  { %914 = vsyncpa [#allocation9 + $0x1], 1 }
 0x1fa   :  { %915 = vsyncpa [#allocation14], 1 }
 0x1fb   :  { %917 = vsyncpa [#allocation14 + $0x1], 1 }

</bundles_post_ra>
